<compile_context>
chip_gen: v6e
topology: v6e:2x2x1
jax: 0.10.0
libtpu: 0.0.40
codegen_flags: <defaults>
</compile_context>

<pallas_src>
import functools

import jax
import jax.numpy as jnp
from jax.experimental import pallas as pl
from jax.experimental.pallas import tpu as pltpu


def _round_up(x, m):
    return -(-x // m) * m


def _tpu_hardware():
    """Best-effort (tensorcores_per_chip, physical_vmem_bytes) query."""
    vmem = 128 * 1024 * 1024
    cores = 1
    try:
        info = pltpu.get_tpu_info()
        vmem = int(getattr(info, "vmem_capacity_bytes", vmem))
        for attr in ("num_cores", "core_count", "tensorcore_count",
                     "num_tensorcores", "tensorcores_per_chip"):
            v = getattr(info, attr, None)
            if v:
                cores = max(cores, int(v))
                break
    except Exception:
        pass
    try:
        kind = jax.devices()[0].device_kind.lower()
    except Exception:
        kind = ""
    # v7x: 2 TensorCores per chip, only 64 MiB VMEM per TensorCore.
    if "7" in kind:
        cores = max(cores, 2)
        vmem = min(vmem, 64 * 1024 * 1024)
    return cores, vmem


def _pick_col_tile(n_cols, cap):
    """Largest lane-dense (multiple-of-128) column tile <= cap.

    Prefers a tile that divides `n_cols` exactly (no masked tail tile);
    falls back to `cap` with an in-kernel column mask otherwise.
    """
    lane = 128
    cap = max(lane, (cap // lane) * lane)
    cols_pad = _round_up(n_cols, lane)
    if cols_pad <= cap:
        return cols_pad                      # whole row extent in one tile
    if n_cols % lane == 0:
        base = n_cols // lane
        for k in range(cap // lane, 0, -1):
            if base % k == 0:
                tc = k * lane
                if 2 * tc >= cap:            # divisor close enough to the cap
                    return tc
                break
    return cap                               # masked tail tile


def _kd_kernel(x_ref, y_ref, out_ref, acc_ref, *,
               n_rows, n_cols, tr, tc, nj_c, squared,
               need_row_mask, need_col_mask):
    c = pl.program_id(0)          # TensorCore split (leading "parallel" axis)
    i = pl.program_id(1)          # row tile (batch rows)
    j = pl.program_id(2)          # column tile within this core's range

    # NOTE: this re-init relies on the default row-major grid order: on a
    # single-core chip the c axis is an outer *serial* loop, so (i==0)&(j==0)
    # fires again at the start of every c iteration; on a 2-core chip each
    # core starts its own (i, j) loop at (0, 0).
    @pl.when((i == 0) & (j == 0))
    def _init():
        acc_ref[...] = jnp.zeros_like(acc_ref)

    x = x_ref[...].astype(jnp.float32)
    y = y_ref[...].astype(jnp.float32)
    d = x - y
    val = d * d if squared else d

    if need_row_mask or need_col_mask:
        mask = None
        if need_row_mask:
            rows = i * tr + jax.lax.broadcasted_iota(jnp.int32, (tr, 1), 0)
            mask = rows < n_rows
        if need_col_mask:
            # Use the *logical* (unclamped) column offset so that the
            # duplicated tile a core may get when nj is odd, the ragged
            # column tail, and the student's extra (non-distilled) channels
            # are all zeroed.
            cols = (c * nj_c + j) * tc + jax.lax.broadcasted_iota(
                jnp.int32, (1, tc), 1)
            cmask = cols < n_cols
            mask = cmask if mask is None else jnp.logical_and(mask, cmask)
        val = jnp.where(mask, val, 0.0)

    # Hot loop: fold only 8-sublane vreg groups (pure VPU adds; no XLU
    # cross-lane/sublane reduce and no tiny masked store per tile).
    if tr == 8:
        acc_ref[...] += val
    else:
        acc_ref[...] += val.reshape(tr // 8, 8, tc).sum(axis=0)

    # One cross-lane reduce + tiny store per core, on its last grid step.
    @pl.when((i == pl.num_programs(1) - 1) & (j == pl.num_programs(2) - 1))
    def _finalize():
        total_c = jnp.sum(acc_ref[...], axis=(0, 1), keepdims=True)   # (1, 1)
        out_ref[...] = total_c.reshape(1, 1, 1)


def cosine_kd_loss(inputs, targets, *, reduction="mean", norm="L2",
                   vmem_input_budget_bytes=None):
    """Pallas TPU forward pass of CosineKnowledgeDistillationLoss."""
    if inputs.ndim < 2 or targets.ndim != inputs.ndim:
        raise ValueError("inputs/targets must have matching rank >= 2 (N, C, ...)")
    N = int(inputs.shape[0])
    C_in = int(inputs.shape[1])
    Ct = int(targets.shape[1])
    spatial = tuple(int(s) for s in inputs.shape[2:])
    if int(targets.shape[0]) != N or tuple(int(s) for s in targets.shape[2:]) != spatial:
        raise ValueError("inputs/targets batch/spatial dims must match")
    if Ct > C_in:
        raise ValueError("targets has more channels than inputs")

    L = 1
    for s in spatial:
        L *= s
    Lr = Ct * L                        # valid (distilled) columns per batch row

    # Free 2-D views over the original contiguous NCHW slabs.  No channel
    # narrow is materialized: the kernel's column tiles simply never use data
    # past column Lr of the (N, C_in*L) student slab.
    x = inputs.reshape(N, C_in * L)
    y = targets.reshape(N, Lr)

    # ---- generation-aware VMEM budget -------------------------------------
    n_cores_req, vmem_bytes = _tpu_hardware()
    if vmem_bytes >= 100 * 2**20:          # v5e / v6e: 128 MiB physical VMEM
        default_budget, vmem_limit = 32 * 2**20, 80 * 2**20
    else:                                  # v7x: 64 MiB per TensorCore
        default_budget, vmem_limit = 16 * 2**20, 44 * 2**20
    budget = int(vmem_input_budget_bytes or default_budget)

    # ---- tile selection ----------------------------------------------------
    itemsize = max(inputs.dtype.itemsize, targets.dtype.itemsize)
    sub = max(8, 32 // itemsize)           # dtype-native sublane multiple
    tr = min(_round_up(N, sub), _round_up(256, sub))
    ni = pl.cdiv(N, tr)

    # Column tile: lane-dense, sized from the budget (2 inputs x 2 buffers).
    tc_budget = budget // (4 * itemsize * tr)
    tc_budget = max(128, min(tc_budget, 65536))
    if n_cores_req > 1:
        # Leave room for a column split across the TensorCores.
        tc_budget = min(tc_budget,
                        max(128, _round_up(pl.cdiv(Lr, n_cores_req), 128)))
    tc = _pick_col_tile(Lr, tc_budget)
    nj = pl.cdiv(Lr, tc)

    n_cores = max(1, min(n_cores_req, nj))     # never split with < 2 col tiles
    nj_c = pl.cdiv(nj, n_cores)

    need_col_mask = (n_cores * nj_c * tc) > Lr
    need_row_mask = (ni * tr) > N
    clamp_cols = (n_cores * nj_c) > nj         # odd split -> last core dups a tile

    if clamp_cols:
        def col_block(c, j):
            # Keep the DMA start in-bounds; the duplicated tile is zeroed in
            # the kernel via the unclamped logical column offset.
            return jnp.minimum(c * nj_c + j, nj - 1)
    else:
        def col_block(c, j):
            return c * nj_c + j

    in_spec = pl.BlockSpec((tr, tc), lambda c, i, j: (i, col_block(c, j)))

    kernel = functools.partial(
        _kd_kernel, n_rows=N, n_cols=Lr, tr=tr, tc=tc, nj_c=nj_c,
        squared=(norm.upper() == "L2"),
        need_row_mask=need_row_mask, need_col_mask=need_col_mask)

    partials = pl.pallas_call(
        kernel,
        out_shape=jax.ShapeDtypeStruct((n_cores, 1, 1), jnp.float32),
        grid_spec=pltpu.PrefetchScalarGridSpec(
            num_scalar_prefetch=0,
            grid=(n_cores, ni, nj_c),
            in_specs=[in_spec, in_spec],
            out_specs=pl.BlockSpec((1, 1, 1), lambda c, i, j: (c, 0, 0)),
            scratch_shapes=[pltpu.VMEM((8, tc), jnp.float32)],
        ),
        compiler_params=pltpu.CompilerParams(
            dimension_semantics=("parallel", "arbitrary", "arbitrary"),
            vmem_limit_bytes=int(vmem_limit)),
        cost_estimate=pl.CostEstimate(
            flops=int(3 * N * Lr),
            transcendentals=0,
            bytes_accessed=int(N * Lr * (inputs.dtype.itemsize
                                         + targets.dtype.itemsize) + 4 * n_cores)),
    )(x, y)

    total = jnp.sum(partials)
    if reduction == "mean":
        return total / float(N * Lr)           # == total / (N * Ct * L)
    elif reduction == "sum":
        return total / float(Ct)                # channel-mean, then sum
    else:
        # TODO(synk): reduction='none' needs a per-pixel (N, *spatial) output kernel.
        raise NotImplementedError("only 'mean' and 'sum' reductions are supported")


def _reference(inputs, targets, *, reduction="mean", norm="L2"):
    """Pure-JAX mirror of the PyTorch module (f32 accumulation, for checks)."""
    x = inputs[:, : targets.shape[1]].astype(jnp.float32)
    t = targets.astype(jnp.float32)
    if norm.upper() == "L2":
        loss = jnp.mean((x - t) ** 2, axis=1)
    else:
        loss = jnp.mean(x - t, axis=1)
    if reduction == "mean":
        return jnp.mean(loss)
    if reduction == "sum":
        return jnp.sum(loss)
    return loss


if __name__ == "__main__":
    key = jax.random.PRNGKey(0)
    k1, k2, k3, k4, k5, k6 = jax.random.split(key, 6)

    # 1. Small canonical case: C_t < C_in, L2/mean and L1/sum.
    x = jax.random.normal(k1, (2, 8, 16, 16), dtype=jnp.float32)
    t = jax.random.normal(k2, (2, 4, 16, 16), dtype=jnp.float32)
    out = jax.block_until_ready(cosine_kd_loss(x, t, reduction="mean", norm="L2"))
    ref = _reference(x, t, reduction="mean", norm="L2")
    assert jnp.allclose(out, ref, atol=1e-5, rtol=1e-5), (out, ref)

    out = jax.block_until_ready(cosine_kd_loss(x, t, reduction="sum", norm="L1"))
    ref = _reference(x, t, reduction="sum", norm="L1")
    assert jnp.allclose(out, ref, atol=1e-3, rtol=1e-3), (out, ref)

    # 2. bf16 inputs, ragged column extent (C_t*L not a multiple of 128).
    xb = jax.random.normal(k3, (4, 6, 10, 10), dtype=jnp.bfloat16)
    tb = jax.random.normal(k4, (4, 5, 10, 10), dtype=jnp.bfloat16)
    out = jax.block_until_ready(cosine_kd_loss(xb, tb, reduction="mean", norm="L2"))
    ref = _reference(xb, tb, reduction="mean", norm="L2")
    assert jnp.allclose(out, ref, atol=1e-3, rtol=1e-3), (out, ref)

    # 3. Tiny forced budget: multi-column-tile accumulation + masking/core split.
    out = jax.block_until_ready(
        cosine_kd_loss(x, t, reduction="mean", norm="L2",
                       vmem_input_budget_bytes=64 * 1024))
    ref = _reference(x, t, reduction="mean", norm="L2")
    assert jnp.allclose(out, ref, atol=1e-5, rtol=1e-5), (out, ref)

    # 4. Taller batch: exercises the multi-vreg-group (tr > 8) accumulator path.
    x4 = jax.random.normal(k5, (24, 3, 8, 8), dtype=jnp.float32)
    t4 = jax.random.normal(k6, (24, 2, 8, 8), dtype=jnp.float32)
    out = jax.block_until_ready(cosine_kd_loss(x4, t4, reduction="sum", norm="L2"))
    ref = _reference(x4, t4, reduction="sum", norm="L2")
    assert jnp.allclose(out, ref, atol=1e-4, rtol=1e-4), (out, ref)

    print("KERNEL_OK")
</pallas_src>

<mosaic_0001>
module attributes {stable_mosaic.version = 11 : i64} {
  func.func @_kd_kernel(%arg0: i32, %arg1: i32, %arg2: i32, %arg3: memref<8x1024xf32, #tpu.memory_space<vmem>>, %arg4: memref<8x1024xf32, #tpu.memory_space<vmem>>, %arg5: memref<1x1x1xf32, #tpu.memory_space<vmem>>, %arg6: memref<8x1024xf32, #tpu.memory_space<vmem>>) attributes {dimension_semantics = [#tpu.dimension_semantics<parallel>, #tpu.dimension_semantics<arbitrary>, #tpu.dimension_semantics<arbitrary>], iteration_bounds = array<i64: 1, 1, 1>, scalar_prefetch = 0 : i64, scratch_operands = 1 : i64, tpu.core_type = #tpu.core_type<tc>, window_params = [{transform_indices = @transform_0, window_bounds = array<i64: 8, 1024>}, {transform_indices = @transform_1, window_bounds = array<i64: 8, 1024>}, {transform_indices = @transform_2, window_bounds = array<i64: 1, 1, 1>}]} {
    %c0_i32 = arith.constant 0 : i32
    %0 = arith.cmpi eq, %arg1, %c0_i32 : i32
    %c0_i32_0 = arith.constant 0 : i32
    %1 = arith.cmpi eq, %arg2, %c0_i32_0 : i32
    %2 = arith.andi %0, %1 : i1
    %3 = arith.extui %2 : i1 to i32
    %c0_i32_1 = arith.constant 0 : i32
    %4 = arith.cmpi ne, %3, %c0_i32_1 : i32
    scf.if %4 {
      %cst_12 = arith.constant 0.000000e+00 : f32
      %27 = vector.broadcast %cst_12 : f32 to vector<8x1024xf32>
      %c0_13 = arith.constant 0 : index
      %c0_14 = arith.constant 0 : index
      %28 = vector.load %arg6[%c0_13, %c0_14] : memref<8x1024xf32, #tpu.memory_space<vmem>>, vector<8x1024xf32>
      tpu.vector_store %arg6[%c0_13, %c0_14], %27 {strides = array<i32>} : memref<8x1024xf32, #tpu.memory_space<vmem>>, vector<8x1024xf32>,
    } else {
    }
    %c0 = arith.constant 0 : index
    %c0_2 = arith.constant 0 : index
    %5 = vector.load %arg3[%c0, %c0_2] : memref<8x1024xf32, #tpu.memory_space<vmem>>, vector<8x1024xf32>
    %c0_3 = arith.constant 0 : index
    %c0_4 = arith.constant 0 : index
    %6 = vector.load %arg4[%c0_3, %c0_4] : memref<8x1024xf32, #tpu.memory_space<vmem>>, vector<8x1024xf32>
    %7 = arith.subf %5, %6 : vector<8x1024xf32>
    %8 = arith.mulf %7, %7 : vector<8x1024xf32>
    %c8_i32 = arith.constant 8 : i32
    %9 = arith.muli %arg1, %c8_i32 : i32
    %10 = tpu.iota {dimensions = array<i32: 0>} : vector<8x1xi32>
    %11 = vector.broadcast %9 : i32 to vector<8x1xi32>
    %12 = arith.addi %11, %10 : vector<8x1xi32>
    %c2_i32 = arith.constant 2 : i32
    %13 = vector.broadcast %c2_i32 : i32 to vector<8x1xi32>
    %14 = arith.cmpi slt, %12, %13 : vector<8x1xi32>
    %cst = arith.constant 0.000000e+00 : f32
    %15 = vector.shape_cast %14 : vector<8x1xi1> to vector<8x1xi1>
    %16 = vector.broadcast %15 : vector<8x1xi1> to vector<8x1024xi1>
    %17 = vector.broadcast %cst : f32 to vector<8x1024xf32>
    %18 = arith.select %16, %8, %17 : vector<8x1024xi1>, vector<8x1024xf32>
    %c0_5 = arith.constant 0 : index
    %c0_6 = arith.constant 0 : index
    %19 = vector.load %arg6[%c0_5, %c0_6] : memref<8x1024xf32, #tpu.memory_space<vmem>>, vector<8x1024xf32>
    %20 = arith.addf %19, %18 : vector<8x1024xf32>
    %c0_7 = arith.constant 0 : index
    %c0_8 = arith.constant 0 : index
    %21 = vector.load %arg6[%c0_7, %c0_8] : memref<8x1024xf32, #tpu.memory_space<vmem>>, vector<8x1024xf32>
    tpu.vector_store %arg6[%c0_7, %c0_8], %20 {strides = array<i32>} : memref<8x1024xf32, #tpu.memory_space<vmem>>, vector<8x1024xf32>,
    %c0_i32_9 = arith.constant 0 : i32
    %22 = arith.cmpi eq, %arg1, %c0_i32_9 : i32
    %c0_i32_10 = arith.constant 0 : i32
    %23 = arith.cmpi eq, %arg2, %c0_i32_10 : i32
    %24 = arith.andi %22, %23 : i1
    %25 = arith.extui %24 : i1 to i32
    %c0_i32_11 = arith.constant 0 : i32
    %26 = arith.cmpi ne, %25, %c0_i32_11 : i32
    scf.if %26 {
      %c0_12 = arith.constant 0 : index
      %c0_13 = arith.constant 0 : index
      %27 = vector.load %arg6[%c0_12, %c0_13] : memref<8x1024xf32, #tpu.memory_space<vmem>>, vector<8x1024xf32>
      %28 = vector.shape_cast %27 : vector<8x1024xf32> to vector<1x8x1024xf32>
      %cst_14 = arith.constant dense<0.000000e+00> : vector<1xf32>
      %29 = vector.multi_reduction <add>, %28, %cst_14 [1, 2] : vector<1x8x1024xf32> to vector<1xf32>
      %30 = vector.shape_cast %29 : vector<1xf32> to vector<1x1x1xf32>
      %31 = vector.extract %30[0, 0, 0] : f32 from vector<1x1x1xf32>
      %32 = vector.broadcast %31 : f32 to vector<1x1xf32>
      %33 = vector.shape_cast %32 : vector<1x1xf32> to vector<1x1x1xf32>
      %c0_15 = arith.constant 0 : index
      %c0_16 = arith.constant 0 : index
      %c0_17 = arith.constant 0 : index
      %34 = vector.load %arg5[%c0_15, %c0_16, %c0_17] : memref<1x1x1xf32, #tpu.memory_space<vmem>>, vector<1x1x1xf32>
      tpu.vector_store %arg5[%c0_15, %c0_16, %c0_17], %33 {strides = array<i32>} : memref<1x1x1xf32, #tpu.memory_space<vmem>>, vector<1x1x1xf32>,
    } else {
    }
    return
  }
  func.func @transform_0(%arg0: i32, %arg1: i32, %arg2: i32) -> (i32, i32) {
    %c1_i32 = arith.constant 1 : i32
    %0 = arith.muli %arg0, %c1_i32 : i32
    %1 = arith.addi %0, %arg2 : i32
    %c0_i32 = arith.constant 0 : i32
    return %arg1, %1 : i32, i32
  }
  func.func @transform_1(%arg0: i32, %arg1: i32, %arg2: i32) -> (i32, i32) {
    %c1_i32 = arith.constant 1 : i32
    %0 = arith.muli %arg0, %c1_i32 : i32
    %1 = arith.addi %0, %arg2 : i32
    %c0_i32 = arith.constant 0 : i32
    return %arg1, %1 : i32, i32
  }
  func.func @transform_2(%arg0: i32, %arg1: i32, %arg2: i32) -> (i32, i32, i32) {
    %c0_i32 = arith.constant 0 : i32
    %c0_i32_0 = arith.constant 0 : i32
    %c0_i32_1 = arith.constant 0 : i32
    return %arg0, %c0_i32, %c0_i32_0 : i32, i32, i32
  }
}

</mosaic_0001>

<bundles_post_ra>
// kernel: tpu_custom_call.1
= control target key start
LH: loop header
LB: loop body
LE: loop exit
PB: predicated region body
PF: predicated region fallthrough
CT: control target
= control target key end

     0   :  { %7 = vsyncpa [#allocation4], 0  ;;  %s397_s0 = inlined_call_operand.hbm [shape: f32[2,2048], index: 0, kind: input, shape index: {}]   ;;  %s398_s1 = inlined_call_operand.hbm [shape: f32[2,1024], index: 1, kind: input, shape index: {}]   ;;  %s399_s2 = inlined_call_operand.hbm [shape: f32[1,1,1], index: 2, kind: output, shape index: {}]  }
   0x1   :  { %8 = vsyncpa [#allocation7], 0 }
   0x2   :  { %9 = vsyncpa [#allocation5], 0 }
   0x3   :  { %16 = vsyncadd [#allocation4], 768  ;;  %s346_s9 = smov [#allocation3]  }
   0x4   :  { %s19_s10 = sshll.u32 %s346_s9, 4  ;;  %s20_s10 = int_to_ptr.vmem [resolvable:$true] %s19_s10 }
   0x5   :  { %s288_s11 = scalar_lea.vmem %s20_s10, 256  ;;  %s292_s12 = scalar_lea.vmem %s20_s10, 1024 }
   0x6   :  { %p289_p0 = scmp.ne.s32.totalorder %s20_s10, %s288_s11  ;;  %p293_p1 = scmp.lt.s32.totalorder %s20_s10, %s20_s10 }
   0x7   :  { %p294_p2 = scmp.lt.s32.totalorder %s292_s12, %s288_s11 }
   0x9   :  { %p295_p3 = por %p294_p2, %p293_p1 }
   0xb   :  { %p296_p4 = pnand %p295_p3, %p289_p0 }
   0xd   :  { %299 = shalt.err (!%p296_p4)
}
   0xe   :  { %s347_s13 = smov 512   ;;  %s348_s14 = smov 256  }
   0xf   :  { %s349_s15 = smov 16  }
  0x10   :  { %25 = dma.hbm_to_vmem [thread:$0]  %s397_s0, 256, %s20_s10, [#allocation4], %s347_s13, %s348_s14, %s349_s15  }
  0x11   :  { %32 = vsyncadd [#allocation7], 768  ;;  %s350_s18 = smov [#allocation6]  }
  0x12   :  { %s35_s19 = sshll.u32 %s350_s18, 4  ;;  %s36_s19 = int_to_ptr.vmem [resolvable:$true] %s35_s19 }
  0x13   :  { %s308_s20 = scalar_lea.vmem %s36_s19, 256  ;;  %s312_s21 = scalar_lea.vmem %s36_s19, 1024 }
  0x14   :  { %p309_p5 = scmp.ne.s32.totalorder %s36_s19, %s308_s20  ;;  %p313_p6 = scmp.lt.s32.totalorder %s36_s19, %s36_s19 }
  0x15   :  { %p314_p7 = scmp.lt.s32.totalorder %s312_s21, %s308_s20 }
  0x17   :  { %p315_p8 = por %p314_p7, %p313_p6 }
  0x19   :  { %p316_p9 = pnand %p315_p8, %p309_p5 }
  0x1b   :  { %319 = shalt.err (!%p316_p9)
}
  0x1c   :  { %41 = dma.hbm_to_vmem [thread:$0]  %s398_s1, 256, %s36_s19, [#allocation7], %s348_s14, %s348_s14, %s349_s15  }
  0x1d   :  { %340 = dma.done.wait [#allocation4], 1024  }
  0x1e   :  { %341 = vsyncadd [#allocation4], 4294966272 }
  0x1f   :  { %342 = dma.done.wait [#allocation7], 1024  }
  0x20   :  { %343 = vsyncadd [#allocation7], 4294966272  ;;  %v99_v0 = vlaneseq  ;;  %v351_v1 = vmov 1983009808   ;;  %v66_v3 = vld [vmem:[#allocation3] sm:$0xff]  ;;  %v67_v4 = vld [vmem:[#allocation3 + $0x8] sm:$0xff] }
  0x21   :  { %v119_v2 = vunpack.c.l.s4 %v351_v1  ;;  %v68_v5 = vld [vmem:[#allocation3 + $0x10] sm:$0xff]  ;;  %v69_v8 = vld [vmem:[#allocation3 + $0x18] sm:$0xff]  ;;  %v70_v9 = vld [vmem:[#allocation3 + $0x20] sm:$0xff]  ;;  %s352_s0 = smov [#allocation8]   ;;  %vm253_vm1 = vcmask 0  }
  0x22   :  { %v374_v6 = vshrl.u32 %v99_v0, 7  ;;  %v71_v10 = vld [vmem:[#allocation3 + $0x28] sm:$0xff]  ;;  %v72_v11 = vld [vmem:[#allocation3 + $0x30] sm:$0xff]  ;;  %v73_v12 = vld [vmem:[#allocation3 + $0x38] sm:$0xff]  ;;  %s261_s1 = sshll.u32 %s352_s0, 4  ;;  %s262_s1 = int_to_ptr.vmem [resolvable:$true] %s261_s1 }
  0x23   :  { %v120_v7 = vunpack.c.0.s8 %v119_v2  ;;  %v74_v13 = vld [vmem:[#allocation6] sm:$0xff]  ;;  %v75_v14 = vld [vmem:[#allocation6 + $0x8] sm:$0xff]  ;;  %v76_v15 = vld [vmem:[#allocation6 + $0x10] sm:$0xff]  ;;  %s320_s25 = scalar_lea.vmem %s262_s1, 16  ;;  %s324_s26 = scalar_lea.vmem %s262_s1, 32 }
  0x24   :  { %v77_v16 = vld [vmem:[#allocation6 + $0x18] sm:$0xff]  ;;  %v82_v17 = vsub.f32 %v66_v3, %v74_v13  ;;  %v78_v18 = vld [vmem:[#allocation6 + $0x20] sm:$0xff]  ;;  %v79_v19 = vld [vmem:[#allocation6 + $0x28] sm:$0xff]  ;;  %v83_v21 = vsub.f32 %v67_v4, %v75_v14  ;;  %v84_v22 = vsub.f32 %v68_v5, %v76_v15  ;;  %vm103_vm0 = vcmp.lt.s32.totalorder %v374_v6, 2  ;;  %p321_p10 = scmp.ne.s32.totalorder %s262_s1, %s320_s25  ;;  %p325_p11 = scmp.lt.s32.totalorder %s262_s1, %s262_s1 }
  0x25   :  { %v80_v20 = vld [vmem:[#allocation6 + $0x30] sm:$0xff]  ;;  %v85_v23 = vsub.f32 %v69_v8, %v77_v16  ;;  %v123_v24 = vsub.s32 %v120_v7, %v374_v6  ;;  %v81_v25 = vld [vmem:[#allocation6 + $0x38] sm:$0xff]  ;;  %v86_v26 = vsub.f32 %v70_v9, %v78_v18  ;;  %v87_v27 = vsub.f32 %v71_v10, %v79_v19  ;;  %p326_p12 = scmp.lt.s32.totalorder %s324_s26, %s320_s25 }
  0x26   :  { %v88_v28 = vsub.f32 %v72_v11, %v80_v20  ;;  %v90_v29 = vmul.f32 %v82_v17, %v82_v17  ;;  %v89_v30 = vsub.f32 %v73_v12, %v81_v25  ;;  %v91_v31 = vmul.f32 %v83_v21, %v83_v21 }
  0x27   :  { %v92_v32 = vmul.f32 %v84_v22, %v84_v22  ;;  %v93_v33 = vmul.f32 %v85_v23, %v85_v23  ;;  %v94_v34 = vmul.f32 %v86_v26, %v86_v26  ;;  %v95_v35 = vmul.f32 %v87_v27, %v87_v27  ;;  %p327_p13 = por %p326_p12, %p325_p11 }
  0x28   :  { %v96_v36 = vmul.f32 %v88_v28, %v88_v28  ;;  %v97_v37 = vmul.f32 %v89_v30, %v89_v30 }
  0x29   :  { %v114_v38 = vcombine.low %v90_v29, %v92_v32  ;;  %v115_v39 = vcombine.high %v90_v29, %v92_v32  ;;  %v150_v40 = vcombine.low %v91_v31, %v93_v33  ;;  %v151_v48 = vcombine.high %v91_v31, %v93_v33  ;;  %p328_p0 = pnand %p327_p13, %p321_p10 }
  0x2a   :  { %v116_v41 = vcombine.low %v94_v34, %v96_v36  ;;  %v117_v42 = vcombine.high %v94_v34, %v96_v36  ;;  %v152_v45 = vcombine.low %v95_v35, %v97_v37  ;;  %v153_v49 = vcombine.high %v95_v35, %v97_v37 }
  0x2b   :  { %v124_v43 = vrot.slane %v114_v38, %v123_v24  ;;  %v131_v44 = vrot.slane %v115_v39, %v123_v24  ;;  %v160_v50 = vrot.slane %v150_v40, %v123_v24  ;;  %v167_v58 = vrot.slane %v151_v48, %v123_v24 }
  0x2c   :  { %v138_v46 = vrot.slane %v116_v41, %v123_v24  ;;  %v145_v47 = vrot.slane %v117_v42, %v123_v24  ;;  %v174_v51 = vrot.slane %v152_v45, %v123_v24  ;;  %v181_v59 = vrot.slane %v153_v49, %v123_v24 }
  0x2e   :  { %v146_v52 = vcombine.low %v124_v43, %v138_v46  ;;  %v147_v53 = vcombine.high %v124_v43, %v138_v46  ;;  %v148_v54 = vcombine.low %v131_v44, %v145_v47  ;;  %v149_v55 = vcombine.high %v131_v44, %v145_v47 }
  0x2f   :  { %v182_v60 = vcombine.low %v160_v50, %v174_v51  ;;  %v183_v63 = vcombine.high %v160_v50, %v174_v51  ;;  %v184_v2 = vcombine.low %v167_v58, %v181_v59  ;;  %v185_v5 = vcombine.high %v167_v58, %v181_v59 }
  0x30   :  { %v194_v56 = vsel %vm103_vm0, %v146_v52, 0.0  ;;  %v195_v57 = vsel %vm103_vm0, %v147_v53, 0.0  ;;  %v196_v61 = vsel %vm103_vm0, %v148_v54, 0.0  ;;  %v197_v0 = vsel %vm103_vm0, %v149_v55, 0.0 }
  0x31   :  { %v236_v62 = vadd.f32 %v195_v57, %v194_v56  ;;  %v198_v3 = vsel %vm103_vm0, %v182_v60, 0.0  ;;  %v199_v7 = vsel %vm103_vm0, %v183_v63, 0.0  ;;  %v200_v9 = vsel %vm103_vm0, %v184_v2, 0.0 }
  0x32   :  { %v201_v11 = vsel %vm103_vm0, %v185_v5, 0.0 }
  0x33   :  { %v237_v1 = vadd.f32 %v236_v62, %v196_v61 }
  0x35   :  { %v238_v4 = vadd.f32 %v237_v1, %v197_v0 }
  0x37   :  { %v239_v8 = vadd.f32 %v238_v4, %v198_v3 }
  0x39   :  { %v240_v10 = vadd.f32 %v239_v8, %v199_v7 }
  0x3b   :  { %v241_v12 = vadd.f32 %v240_v10, %v200_v9 }
  0x3d   :  { %v242_v13 = vadd.f32 %v241_v12, %v201_v11 }
  0x3f   :  { %243 = vadd.xlane.f32.xlu0 %v242_v13 }
  0xc8   :  { %v244_v14 = vpop.xlane.xlu0 %243 }
  0xc9   :  { %v245_v15 = vrot.slane %v244_v14, 4 }
  0xcb   :  { %v246_v16 = vadd.f32 %v245_v15, %v244_v14 }
  0xcd   :  { %v247_v17 = vrot.slane %v246_v16, 2 }
  0xcf   :  { %v248_v18 = vadd.f32 %v247_v17, %v246_v16 }
  0xd1   :  { %v249_v19 = vrot.slane %v248_v18, 1 }
  0xd3   :  { %v250_v20 = vadd.f32 %v249_v19, %v248_v18 }
  0xd5   :  { %271 = vpush %v250_v20 }
 0x106   :  { %s272_s24 = spop %271 }
 0x107   :  { %v252_v21 = vstv %s272_s24 }
 0x108   :  { %254 = vst.msk [vmem:[#allocation8] sm:$0x1] %vm253_vm1, %v252_v21 }
 0x109   :  { %331 = shalt.err (!%p328_p0)
}
 0x10a   :  { %264 = dma.vmem_to_hbm [thread:$0]  %s262_s1, 16, %s399_s2, [#allocation5]  }
 0x10b   :  { %344 = dma.done.wait [#allocation5], 16  }
 0x10c   :  { %345 = vsyncadd [#allocation5], 4294967280 }
 0x10d   :  { %268 = vsyncpa [#allocation4], 1 }
 0x10e   :  { %269 = vsyncpa [#allocation7], 1 }
 0x10f   :  { %270 = vsyncpa [#allocation5], 1 }

</bundles_post_ra>
